<compile_context>
chip_gen: v5e
topology: v5e:2x2
jax: 0.10.0
libtpu: 0.0.40
codegen_flags: <defaults>
</compile_context>

<pallas_src>
import functools
import math

import jax
import jax.numpy as jnp
from jax.experimental import pallas as pl
from jax.experimental.pallas import tpu as pltpu

# Scoped VMEM request (safe default on v5e/v6e/v7x; v7x physical is 64 MiB).
_VMEM_LIMIT = 32 * 1024 * 1024
# Planning budget for tile selection: leave headroom below the scoped limit.
_TILE_BUDGET = 24 * 1024 * 1024


def _pick_tile(dim, desired, align):
    """Largest multiple of `align` that divides `dim` and is <= `desired`.
    Falls back to the full dim (full-extent blocks are always legal w.r.t. the
    (8, 128) block-shape rule)."""
    if dim <= desired:
        return dim
    cand = (min(desired, dim) // align) * align
    while cand >= align:
        if dim % cand == 0:
            return cand
        cand -= align
    return dim


# ----------------------------------------------------------------------------
# Kernel 1a: fused QKV projection (self-attention: x is read from HBM once)
# ----------------------------------------------------------------------------
def _qkv_proj_kernel(x_ref, wq_ref, wk_ref, wv_ref, q_ref, k_ref, v_ref,
                     accq, acck, accv):
    kk = pl.program_id(1)

    @pl.when(kk == 0)
    def _():
        accq[...] = jnp.zeros_like(accq)
        acck[...] = jnp.zeros_like(acck)
        accv[...] = jnp.zeros_like(accv)

    x = x_ref[...]  # operands kept in their input dtype (bf16-friendly MXU path)
    accq[...] += jnp.dot(x, wq_ref[...], preferred_element_type=jnp.float32)
    acck[...] += jnp.dot(x, wk_ref[...], preferred_element_type=jnp.float32)
    accv[...] += jnp.dot(x, wv_ref[...], preferred_element_type=jnp.float32)

    @pl.when(kk == pl.num_programs(1) - 1)
    def _():
        q_ref[...] = accq[...].astype(q_ref.dtype)
        k_ref[...] = acck[...].astype(k_ref.dtype)
        v_ref[...] = accv[...].astype(v_ref.dtype)


def pallas_qkv_proj(x, wq, wk, wv, *, tm_desired=512, tk_desired=512):
    M, K = x.shape
    Nq, Nk, Nv = wq.shape[1], wk.shape[1], wv.shape[1]
    Nsum = Nq + Nk + Nv
    it = x.dtype.itemsize

    def fits(tm, tk):
        vmem = 2 * tm * tk * it          # x tile (double-buffered)
        vmem += 2 * tk * Nsum * it       # weight tiles
        vmem += 2 * tm * Nsum * it       # output tiles
        vmem += tm * Nsum * 4            # f32 accumulators
        return vmem <= _TILE_BUDGET

    tm = _pick_tile(M, tm_desired, 8)
    # Prefer the weight-resident plan: weights fetched exactly once, full-K MXU
    # contraction, activation rows streamed.
    if fits(tm, K):
        tk = K
    else:
        tk = _pick_tile(K, tk_desired, 128)
        while not fits(tm, tk) and tm > 8:
            new_tm = _pick_tile(M, max(8, tm // 2), 8)
            if new_tm == tm:
                break
            tm = new_tm

    return pl.pallas_call(
        _qkv_proj_kernel,
        out_shape=(
            jax.ShapeDtypeStruct((M, Nq), x.dtype),
            jax.ShapeDtypeStruct((M, Nk), x.dtype),
            jax.ShapeDtypeStruct((M, Nv), x.dtype),
        ),
        grid=(M // tm, K // tk),
        in_specs=[
            pl.BlockSpec((tm, tk), lambda i, kk: (i, kk)),
            pl.BlockSpec((tk, Nq), lambda i, kk: (kk, 0)),
            pl.BlockSpec((tk, Nk), lambda i, kk: (kk, 0)),
            pl.BlockSpec((tk, Nv), lambda i, kk: (kk, 0)),
        ],
        out_specs=(
            pl.BlockSpec((tm, Nq), lambda i, kk: (i, 0)),
            pl.BlockSpec((tm, Nk), lambda i, kk: (i, 0)),
            pl.BlockSpec((tm, Nv), lambda i, kk: (i, 0)),
        ),
        scratch_shapes=[
            pltpu.VMEM((tm, Nq), jnp.float32),
            pltpu.VMEM((tm, Nk), jnp.float32),
            pltpu.VMEM((tm, Nv), jnp.float32),
        ],
        compiler_params=pltpu.CompilerParams(
            dimension_semantics=("parallel", "arbitrary"),
            vmem_limit_bytes=_VMEM_LIMIT,
        ),
    )(x, wq, wk, wv)


# ----------------------------------------------------------------------------
# Kernel 1b: generic tiled matmul (cross-attention projection path)
# ----------------------------------------------------------------------------
def _matmul_kernel(x_ref, w_ref, o_ref, acc_ref):
    @pl.when(pl.program_id(2) == 0)
    def _():
        acc_ref[...] = jnp.zeros_like(acc_ref)

    acc_ref[...] += jnp.dot(x_ref[...], w_ref[...],
                            preferred_element_type=jnp.float32)

    @pl.when(pl.program_id(2) == pl.num_programs(2) - 1)
    def _():
        o_ref[...] = acc_ref[...].astype(o_ref.dtype)


def pallas_matmul(x, w, *, tm_desired=512, tn_desired=256, tk_desired=512):
    M, K = x.shape
    K2, N = w.shape
    assert K == K2
    it = x.dtype.itemsize

    def fits(tm, tn, tk):
        vmem = 2 * tm * tk * it + 2 * tk * tn * it + 2 * tm * tn * it + tm * tn * 4
        return vmem <= _TILE_BUDGET

    tm = _pick_tile(M, tm_desired, 8)
    # Prefer the weight-resident plan (single fetch, full-K contraction).
    if fits(tm, N, K):
        tn, tk = N, K
    else:
        tn = _pick_tile(N, tn_desired, 128)
        tk = _pick_tile(K, tk_desired, 128)
        while not fits(tm, tn, tk) and tm > 8:
            new_tm = _pick_tile(M, max(8, tm // 2), 8)
            if new_tm == tm:
                break
            tm = new_tm

    return pl.pallas_call(
        _matmul_kernel,
        out_shape=jax.ShapeDtypeStruct((M, N), x.dtype),
        grid=(M // tm, N // tn, K // tk),
        in_specs=[
            pl.BlockSpec((tm, tk), lambda i, j, kk: (i, kk)),
            pl.BlockSpec((tk, tn), lambda i, j, kk: (kk, j)),
        ],
        out_specs=pl.BlockSpec((tm, tn), lambda i, j, kk: (i, j)),
        scratch_shapes=[pltpu.VMEM((tm, tn), jnp.float32)],
        compiler_params=pltpu.CompilerParams(
            dimension_semantics=("parallel", "parallel", "arbitrary"),
            vmem_limit_bytes=_VMEM_LIMIT,
        ),
    )(x, w)


# ----------------------------------------------------------------------------
# Kernel 2: scaled-dot-product attention, query-tiled, all heads per grid step.
#           Inputs are (B, S, H, d); outputs are (B, S, H, d_v) + (B, H, S, S).
# ----------------------------------------------------------------------------
def _attention_kernel(q_ref, k_ref, v_ref, o_ref, w_ref, *, scale):
    # (tq, H, d) / (S, H, d) blocks -> head-leading for batched MXU matmuls.
    q = jnp.swapaxes(q_ref[0], 0, 1) * scale        # (H, tq, d_k), pre-scaled q
    k = jnp.swapaxes(k_ref[0], 0, 1)                # (H, S,  d_k)
    v = jnp.swapaxes(v_ref[0], 0, 1)                # (H, S,  d_v)

    # contraction on the last dims (no materialized k.T), f32 accumulation
    s = jnp.einsum("hqd,hkd->hqk", q, k,
                   preferred_element_type=jnp.float32)        # (H, tq, S)
    m = jnp.max(s, axis=-1, keepdims=True)
    e = jnp.exp(s - m)
    denom = jnp.sum(e, axis=-1, keepdims=True)
    p = e * pl.reciprocal(denom, approx=True)                 # softmax over keys

    p_lo = p.astype(v.dtype)                                  # single down-cast
    w_ref[0] = p_lo.astype(w_ref.dtype)                       # (H, tq, S)

    o = jnp.einsum("hqk,hkd->hqd", p_lo, v,
                   preferred_element_type=jnp.float32)        # (H, tq, d_v)
    o_ref[0] = jnp.swapaxes(o, 0, 1).astype(o_ref.dtype)      # (tq, H, d_v)


def pallas_attention(qh, kh, vh):
    # qh: (B, S_q, H, d_k); kh: (B, S_k, H, d_k); vh: (B, S_k, H, d_v)
    B, S_q, H, d_k = qh.shape
    S_k = kh.shape[1]
    d_v = vh.shape[-1]
    scale = 1.0 / math.sqrt(d_k)
    it = qh.dtype.itemsize

    # Choose tq so (double-buffered) q/out/weight tiles + f32 score temps fit the
    # budget left after the per-batch-resident K/V blocks.
    kv_bytes = 2 * (S_k * H * d_k + S_k * H * d_v) * it
    per_row = (2 * H * d_k + 2 * H * d_v + 2 * H * S_k) * it   # q, out, attn-w tiles
    per_row += 3 * H * S_k * 4                                 # s/e/p f32 temps
    budget = _TILE_BUDGET - kv_bytes
    desired_tq = max(8, min(512, budget // max(per_row, 1)))
    tq = _pick_tile(S_q, desired_tq, 8)

    kernel = functools.partial(_attention_kernel, scale=scale)
    out, attn_w = pl.pallas_call(
        kernel,
        out_shape=(
            jax.ShapeDtypeStruct((B, S_q, H, d_v), qh.dtype),   # scaled attention
            jax.ShapeDtypeStruct((B, H, S_q, S_k), qh.dtype),   # attention weights
        ),
        grid=(B, S_q // tq),
        in_specs=[
            pl.BlockSpec((1, tq, H, d_k), lambda b, i: (b, i, 0, 0)),
            # K/V block indices change only with b -> fetched once per batch,
            # reused across all query tiles.
            pl.BlockSpec((1, S_k, H, d_k), lambda b, i: (b, 0, 0, 0)),
            pl.BlockSpec((1, S_k, H, d_v), lambda b, i: (b, 0, 0, 0)),
        ],
        out_specs=(
            pl.BlockSpec((1, tq, H, d_v), lambda b, i: (b, i, 0, 0)),
            pl.BlockSpec((1, H, tq, S_k), lambda b, i: (b, 0, i, 0)),
        ),
        compiler_params=pltpu.CompilerParams(
            dimension_semantics=("parallel", "parallel"),
            vmem_limit_bytes=_VMEM_LIMIT,
        ),
    )(qh, kh, vh)
    return out, attn_w


# ----------------------------------------------------------------------------
# Kernel 3: output projection + residual + LayerNorm(eps=1e-6), row-tiled
# ----------------------------------------------------------------------------
def _dense_residual_ln_kernel(x_ref, w_ref, res_ref, g_ref, b_ref, o_ref, *, eps):
    y = jnp.dot(x_ref[...], w_ref[...], preferred_element_type=jnp.float32)
    y = y + res_ref[...].astype(jnp.float32)
    mean = jnp.mean(y, axis=-1, keepdims=True)
    var = jnp.mean(jnp.square(y - mean), axis=-1, keepdims=True)
    yn = (y - mean) * jax.lax.rsqrt(var + eps)
    o_ref[...] = (yn * g_ref[...].astype(jnp.float32)
                  + b_ref[...].astype(jnp.float32)).astype(o_ref.dtype)


def pallas_dense_residual_ln(x, w, residual, gamma, beta, eps=1e-6, tm_desired=512):
    M, K = x.shape
    K2, N = w.shape
    assert K == K2 and residual.shape == (M, N)
    it = x.dtype.itemsize

    # Weight / gamma / beta are resident (constant block index -> fetched once);
    # size the row tile against what remains of the budget.
    fixed = 2 * K * N * it + 4 * N * it
    per_row = (2 * K + 2 * N + 2 * N) * it + 2 * N * 4
    avail = max(_TILE_BUDGET - fixed, 8 * per_row)
    tm = _pick_tile(M, max(8, min(tm_desired, avail // max(per_row, 1))), 8)

    kernel = functools.partial(_dense_residual_ln_kernel, eps=eps)
    return pl.pallas_call(
        kernel,
        out_shape=jax.ShapeDtypeStruct((M, N), x.dtype),
        grid=(M // tm,),
        in_specs=[
            pl.BlockSpec((tm, K), lambda i: (i, 0)),
            pl.BlockSpec((K, N), lambda i: (0, 0)),      # full weight resident
            pl.BlockSpec((tm, N), lambda i: (i, 0)),
            pl.BlockSpec((1, N), lambda i: (0, 0)),
            pl.BlockSpec((1, N), lambda i: (0, 0)),
        ],
        out_specs=pl.BlockSpec((tm, N), lambda i: (i, 0)),
        compiler_params=pltpu.CompilerParams(
            dimension_semantics=("parallel",),
            vmem_limit_bytes=_VMEM_LIMIT,
        ),
    )(x, w, residual, gamma, beta)


# ----------------------------------------------------------------------------
# Full forward pass (glue is only free reshapes; no HBM transpose passes)
# ----------------------------------------------------------------------------
def multi_head_attention(params, q, k, v, num_heads, d_k, d_v, eps=1e-6):
    B, S_q, d_model = q.shape
    S_k = k.shape[1]
    residual = q

    # Linear projections (bias-free). Weights stored as (in, out).
    if (q is k) and (k is v):
        # Self-attention: fused projection, x read from HBM once.
        qp, kp, vp = pallas_qkv_proj(q.reshape(B * S_q, d_model),
                                     params["wq"], params["wk"], params["wv"])
    else:
        qp = pallas_matmul(q.reshape(B * S_q, d_model), params["wq"])
        kp = pallas_matmul(k.reshape(B * S_k, d_model), params["wk"])
        vp = pallas_matmul(v.reshape(B * S_k, d_model), params["wv"])

    # split_into_heads is a FREE reshape; attention BlockSpecs index (B,S,H,d).
    qh = qp.reshape(B, S_q, num_heads, d_k)
    kh = kp.reshape(B, S_k, num_heads, d_k)
    vh = vp.reshape(B, S_k, num_heads, d_v)

    # TODO(synk): mask path (mask.unsqueeze(1) + masked_fill) not implemented; mask=None only.
    attn_out, attention_weights = pallas_attention(qh, kh, vh)

    # concat heads: (B, S, H, d_v) -> (B*S, H*d_v) is a FREE reshape.
    concat = attn_out.reshape(B * S_q, num_heads * d_v)

    # dense + (dropout == identity in eval) + residual + layer_norm
    out = pallas_dense_residual_ln(
        concat, params["dense"], residual.reshape(B * S_q, d_model),
        params["ln_gamma"], params["ln_beta"], eps=eps,
    ).reshape(B, S_q, d_model)

    return out, attention_weights


def init_params(key, d_model, num_heads, d_k, d_v, dtype=jnp.float32):
    k1, k2, k3, k4 = jax.random.split(key, 4)
    s = 0.02
    return {
        "wq": (jax.random.normal(k1, (d_model, num_heads * d_k)) * s).astype(dtype),
        "wk": (jax.random.normal(k2, (d_model, num_heads * d_k)) * s).astype(dtype),
        "wv": (jax.random.normal(k3, (d_model, num_heads * d_v)) * s).astype(dtype),
        "dense": (jax.random.normal(k4, (num_heads * d_v, d_model)) * s).astype(dtype),
        "ln_gamma": jnp.ones((1, d_model), dtype),   # PyTorch LayerNorm default init
        "ln_beta": jnp.zeros((1, d_model), dtype),
    }


def reference_mha(params, q, k, v, num_heads, d_k, d_v, eps=1e-6):
    """Pure-JAX reference mirroring the PyTorch module (eval mode, mask=None)."""
    B, S_q, d_model = q.shape
    S_k = k.shape[1]
    residual = q
    qp = (q @ params["wq"]).reshape(B, S_q, num_heads, d_k).transpose(0, 2, 1, 3)
    kp = (k @ params["wk"]).reshape(B, S_k, num_heads, d_k).transpose(0, 2, 1, 3)
    vp = (v @ params["wv"]).reshape(B, S_k, num_heads, d_v).transpose(0, 2, 1, 3)
    scores = jnp.einsum("bhqd,bhkd->bhqk", qp, kp) / math.sqrt(d_k)
    w = jax.nn.softmax(scores, axis=-1)
    o = jnp.einsum("bhqk,bhkd->bhqd", w, vp)
    concat = o.transpose(0, 2, 1, 3).reshape(B, S_q, num_heads * d_v)
    y = concat @ params["dense"] + residual
    mean = y.mean(-1, keepdims=True)
    var = ((y - mean) ** 2).mean(-1, keepdims=True)
    yn = (y - mean) / jnp.sqrt(var + eps)
    return yn * params["ln_gamma"] + params["ln_beta"], w


if __name__ == "__main__":
    B, S, d_model = 2, 8, 32
    num_heads, d_k, d_v = 4, 8, 8

    key = jax.random.PRNGKey(0)
    kq, kk_, kv_, kp_ = jax.random.split(key, 4)
    q_in = jax.random.normal(kq, (B, S, d_model), jnp.float32)
    k_in = jax.random.normal(kk_, (B, S, d_model), jnp.float32)
    v_in = jax.random.normal(kv_, (B, S, d_model), jnp.float32)
    params = init_params(kp_, d_model, num_heads, d_k, d_v)

    # Cross-attention path (distinct q/k/v -> generic tiled-matmul projections).
    out, attn_w = multi_head_attention(params, q_in, k_in, v_in, num_heads, d_k, d_v)
    out = jax.block_until_ready(out)
    attn_w = jax.block_until_ready(attn_w)
    assert out.shape == (B, S, d_model)
    assert attn_w.shape == (B, num_heads, S, S)

    ref_out, ref_w = reference_mha(params, q_in, k_in, v_in, num_heads, d_k, d_v)
    # Loose tolerance: approx EUP reciprocal in the softmax denominator.
    assert float(jnp.max(jnp.abs(out - ref_out))) < 1e-2, "output mismatch"
    assert float(jnp.max(jnp.abs(attn_w - ref_w))) < 1e-2, "attn weights mismatch"

    # Self-attention path (q is k is v -> fused single-read QKV projection kernel).
    out2, attn_w2 = multi_head_attention(params, q_in, q_in, q_in, num_heads, d_k, d_v)
    out2 = jax.block_until_ready(out2)
    attn_w2 = jax.block_until_ready(attn_w2)
    ref_out2, ref_w2 = reference_mha(params, q_in, q_in, q_in, num_heads, d_k, d_v)
    assert float(jnp.max(jnp.abs(out2 - ref_out2))) < 1e-2, "self-attn output mismatch"
    assert float(jnp.max(jnp.abs(attn_w2 - ref_w2))) < 1e-2, "self-attn weights mismatch"

    print("KERNEL_OK")
</pallas_src>

<mosaic_0001>
module attributes {stable_mosaic.version = 11 : i64} {
  func.func @_matmul_kernel(%arg0: i32, %arg1: i32, %arg2: i32, %arg3: memref<16x32xf32, #tpu.memory_space<vmem>>, %arg4: memref<32x32xf32, #tpu.memory_space<vmem>>, %arg5: memref<16x32xf32, #tpu.memory_space<vmem>>, %arg6: memref<16x32xf32, #tpu.memory_space<vmem>>) attributes {dimension_semantics = [#tpu.dimension_semantics<parallel>, #tpu.dimension_semantics<parallel>, #tpu.dimension_semantics<arbitrary>], iteration_bounds = array<i64: 1, 1, 1>, scalar_prefetch = 0 : i64, scratch_operands = 1 : i64, tpu.core_type = #tpu.core_type<tc>, window_params = [{transform_indices = @transform_0, window_bounds = array<i64: 16, 32>}, {transform_indices = @transform_1, window_bounds = array<i64: 32, 32>}, {transform_indices = @transform_2, window_bounds = array<i64: 16, 32>}]} {
    %c0_i32 = arith.constant 0 : i32
    %0 = arith.cmpi eq, %arg2, %c0_i32 : i32
    %1 = arith.extui %0 : i1 to i32
    %c0_i32_0 = arith.constant 0 : i32
    %2 = arith.cmpi ne, %1, %c0_i32_0 : i32
    scf.if %2 {
      %cst_10 = arith.constant 0.000000e+00 : f32
      %12 = vector.broadcast %cst_10 : f32 to vector<16x32xf32>
      %c0_11 = arith.constant 0 : index
      %c0_12 = arith.constant 0 : index
      %13 = vector.load %arg6[%c0_11, %c0_12] : memref<16x32xf32, #tpu.memory_space<vmem>>, vector<16x32xf32>
      tpu.vector_store %arg6[%c0_11, %c0_12], %12 {strides = array<i32>} : memref<16x32xf32, #tpu.memory_space<vmem>>, vector<16x32xf32>,
    } else {
    }
    %c0 = arith.constant 0 : index
    %c0_1 = arith.constant 0 : index
    %3 = vector.load %arg6[%c0, %c0_1] : memref<16x32xf32, #tpu.memory_space<vmem>>, vector<16x32xf32>
    %c0_2 = arith.constant 0 : index
    %c0_3 = arith.constant 0 : index
    %4 = vector.load %arg3[%c0_2, %c0_3] : memref<16x32xf32, #tpu.memory_space<vmem>>, vector<16x32xf32>
    %c0_4 = arith.constant 0 : index
    %c0_5 = arith.constant 0 : index
    %5 = vector.load %arg4[%c0_4, %c0_5] : memref<32x32xf32, #tpu.memory_space<vmem>>, vector<32x32xf32>
    %cst = arith.constant dense<0.000000e+00> : vector<16x32xf32>
    %6 = tpu.matmul %4, %5, %cst {dimension_numbers = #tpu.dot_dimension_numbers<[1], [0], [0], [1], [0, 0, 1, 1], [], []>} : vector<16x32xf32>, vector<32x32xf32>, vector<16x32xf32> -> vector<16x32xf32>
    %7 = arith.addf %3, %6 : vector<16x32xf32>
    %c0_6 = arith.constant 0 : index
    %c0_7 = arith.constant 0 : index
    %8 = vector.load %arg6[%c0_6, %c0_7] : memref<16x32xf32, #tpu.memory_space<vmem>>, vector<16x32xf32>
    tpu.vector_store %arg6[%c0_6, %c0_7], %7 {strides = array<i32>} : memref<16x32xf32, #tpu.memory_space<vmem>>, vector<16x32xf32>,
    %c0_i32_8 = arith.constant 0 : i32
    %9 = arith.cmpi eq, %arg2, %c0_i32_8 : i32
    %10 = arith.extui %9 : i1 to i32
    %c0_i32_9 = arith.constant 0 : i32
    %11 = arith.cmpi ne, %10, %c0_i32_9 : i32
    scf.if %11 {
      %c0_10 = arith.constant 0 : index
      %c0_11 = arith.constant 0 : index
      %12 = vector.load %arg6[%c0_10, %c0_11] : memref<16x32xf32, #tpu.memory_space<vmem>>, vector<16x32xf32>
      %c0_12 = arith.constant 0 : index
      %c0_13 = arith.constant 0 : index
      %13 = vector.load %arg5[%c0_12, %c0_13] : memref<16x32xf32, #tpu.memory_space<vmem>>, vector<16x32xf32>
      tpu.vector_store %arg5[%c0_12, %c0_13], %12 {strides = array<i32>} : memref<16x32xf32, #tpu.memory_space<vmem>>, vector<16x32xf32>,
    } else {
    }
    return
  }
  func.func @transform_0(%arg0: i32, %arg1: i32, %arg2: i32) -> (i32, i32) {
    %c0_i32 = arith.constant 0 : i32
    return %arg0, %arg2 : i32, i32
  }
  func.func @transform_1(%arg0: i32, %arg1: i32, %arg2: i32) -> (i32, i32) {
    %c0_i32 = arith.constant 0 : i32
    return %arg2, %arg1 : i32, i32
  }
  func.func @transform_2(%arg0: i32, %arg1: i32, %arg2: i32) -> (i32, i32) {
    %c0_i32 = arith.constant 0 : i32
    return %arg0, %arg1 : i32, i32
  }
}

</mosaic_0001>

<bundles_post_ra>
// kernel: tpu_custom_call.1
= control target key start
LH: loop header
LB: loop body
LE: loop exit
PB: predicated region body
PF: predicated region fallthrough
CT: control target
= control target key end

     0   :  { %7 = vsyncpa [#allocation4], 0  ;;  %s257_s0 = inlined_call_operand.hbm [shape: f32[16,32], index: 0, kind: input, shape index: {}]   ;;  %s258_s1 = inlined_call_operand.hbm [shape: f32[32,32], index: 1, kind: input, shape index: {}]   ;;  %s259_s2 = inlined_call_operand.hbm [shape: f32[16,32], index: 2, kind: output, shape index: {}]  }
   0x1   :  { %8 = vsyncpa [#allocation7], 0 }
   0x2   :  { %9 = vsyncpa [#allocation5], 0  ;;  %s14_s11 = sshll.u32 %s257_s0, 4  ;;  %s210_s12 = smov [#allocation3]   ;;  %s15_s11 = int_to_ptr.hbm [resolvable:$true] %s14_s11 }
   0x3   :  { %s16_s13 = sshll.u32 %s210_s12, 4  ;;  %s27_s16 = sshll.u32 %s258_s1, 4  ;;  %s17_s13 = int_to_ptr.vmem [resolvable:$true] %s16_s13  ;;  %s28_s16 = int_to_ptr.hbm [resolvable:$true] %s27_s16 }
   0x4   :  { %s211_s17 = smov 128   ;;  %s212_s18 = smov 8  }
   0x5   :  { %22 = dma.hbm_to_vmem [thread:$0]  %s15_s11, 256, %s17_s13, [#allocation4], %s211_s17, %s211_s17, %s212_s18  }
   0x6   :  { %s213_s19 = smov [#allocation6]  }
   0x7   :  { %s29_s20 = sshll.u32 %s213_s19, 4  ;;  %s30_s20 = int_to_ptr.vmem [resolvable:$true] %s29_s20 }
   0x8   :  { %35 = dma.hbm_to_vmem [thread:$0]  %s28_s16, 512, %s30_s20, [#allocation7], %s211_s17, %s211_s17, %s212_s18  }
   0x9   :  { %204 = dma.done.wait [#allocation4], 256  }
   0xa   :  { %205 = vsyncadd [#allocation4], 4294967040 }
   0xb   :  { %206 = dma.done.wait [#allocation7], 512  }
   0xc   :  { %207 = vsyncadd [#allocation7], 4294966784  ;;  %vm48_vm0 = vcmask 261120   ;;  %v214_v0 = vmov 0.0   ;;  %v58_v1 = vld [vmem:[#allocation6 + $0x18] sm:$0xff]  ;;  %v57_v2 = vld [vmem:[#allocation6 + $0x10] sm:$0xff] }
   0xd   :  { %49 = vst.msk [vmem:[#allocation2] sm:$0xff] %vm48_vm0, %v214_v0  ;;  %78 = vmatpush.msra.mxu0 %v58_v1  ;;  %122 = vmatpush.msra.mxu1 %v58_v1  ;;  %v56_v3 = vld [vmem:[#allocation6 + $0x8] sm:$0xff]  ;;  %v55_v4 = vld [vmem:[#allocation6] sm:$0xff]  ;;  %v53_v5 = vld [vmem:[#allocation3] sm:$0xff]  ;;  %s215_s0 = smov [#allocation8]   ;;  %s106_s23 = sshll.u32 %s259_s2, 4  ;;  %s107_s23 = int_to_ptr.hbm [resolvable:$true] %s106_s23 }
   0xe   :  { %50 = vst.msk [vmem:[#allocation2 + $0x8] sm:$0xff] %vm48_vm0, %v214_v0  ;;  %v54_v6 = vld [vmem:[#allocation3 + $0x8] sm:$0xff]  ;;  %s104_s1 = sshll.u32 %s215_s0, 4  ;;  %s105_s1 = int_to_ptr.vmem [resolvable:$true] %s104_s1 }
   0xf   :  { %79 = vmatpush.msra.mxu0 %v57_v2  ;;  %123 = vmatpush.msra.mxu1 %v57_v2 }
  0x11   :  { %80 = vmatpush.msra.mxu0 %v56_v3  ;;  %124 = vmatpush.msra.mxu1 %v56_v3 }
  0x13   :  { %81 = vmatpush.msra.mxu0 %v55_v4  ;;  %125 = vmatpush.msra.mxu1 %v55_v4 }
  0x14   :  { %120 = vmatmul.msk.f32.vlgmr.msra.gmra.mxu0 %vm48_vm0, %v53_v5  ;;  %121 = vmatmul.msk.f32.vlgmr.msra.gmra.mxu1 %vm48_vm0, %v54_v6  ;;  %v51_v7 = vld [vmem:[#allocation2] sm:$0xff] }
  0x15   :  { %v52_v8 = vld [vmem:[#allocation2 + $0x8] sm:$0xff] }
  0x91   :  { %v83_v9 = vpop.f32.mrf.mxu0  ;;  %v86_v10 = vpop.f32.mrf.mxu1 }
  0x92   :  { %v89_v11 = vadd.f32 %v83_v9, %v51_v7  ;;  %v90_v12 = vadd.f32 %v86_v10, %v52_v8 }
  0x94   :  { %91 = vst.msk [vmem:[#allocation2] sm:$0xff] %vm48_vm0, %v89_v11 }
  0x95   :  { %92 = vst.msk [vmem:[#allocation2 + $0x8] sm:$0xff] %vm48_vm0, %v90_v12 }
  0x9b   :  { %v96_v13 = vld [vmem:[#allocation2] sm:$0xff] }
  0x9c   :  { %v97_v14 = vld [vmem:[#allocation2 + $0x8] sm:$0xff]  ;;  %98 = vst.msk [vmem:[#allocation8] sm:$0xff] %vm48_vm0, %v96_v13 }
  0x9d   :  { %99 = vst.msk [vmem:[#allocation8 + $0x8] sm:$0xff] %vm48_vm0, %v97_v14 }
  0x9e   :  { %112 = dma.vmem_to_hbm [thread:$0]  %s105_s1, 256, %s107_s23, [#allocation5], %s211_s17, %s211_s17, %s212_s18  }
  0x9f   :  { %208 = dma.done.wait [#allocation5], 256  }
  0xa0   :  { %209 = vsyncadd [#allocation5], 4294967040 }
  0xa1   :  { %117 = vsyncpa [#allocation4], 1 }
  0xa2   :  { %118 = vsyncpa [#allocation7], 1 }
  0xa3   :  { %119 = vsyncpa [#allocation5], 1 }

</bundles_post_ra>
